<compile_context>
chip_gen: v5e
topology: v5e:2x2
jax: 0.10.0
libtpu: 0.0.40
codegen_flags: <defaults>
</compile_context>

<pallas_src>
import functools

import jax
import jax.numpy as jnp
from jax import lax
from jax.experimental import pallas as pl
from jax.experimental.pallas import tpu as pltpu

_LANES = 128
_SUBLANES = 8


def _round_up(x, m):
    return ((x + m - 1) // m) * m


def _cdiv(a, b):
    return -(-a // b)


def pack_flat(v):
    """One-time packing of a flat 1-D vector into the lane/sublane-dense
    (rows, 128) layout consumed by `l2sp_loss_forward`.

    Call this ONCE at setup (bb_loc is frozen; keep params in this layout
    across training steps if possible) so the forward pass never pays a full
    pad/copy of the parameter vector in HBM."""
    n = int(v.shape[0])
    rows = _round_up(_cdiv(max(n, 1), _LANES), _SUBLANES)
    pad = rows * _LANES - n
    if pad:
        v = jnp.pad(v, (0, pad))
    return v.reshape(rows, _LANES)


def _fold_to_vreg(x, rows):
    """Reduce (rows, 128) -> (8, 128) using only vector adds (no XLU)."""
    if rows == _SUBLANES:
        return x
    return jnp.sum(x.reshape(rows // _SUBLANES, _SUBLANES, _LANES), axis=0)


# ---------------------------------------------------------------------------
# Fused kernel: mean cross-entropy + L2-SP regularizer, dual-stream reduction.
# ---------------------------------------------------------------------------
def _l2sp_kernel(
    logits_ref,        # (tile_n, C)        storage dtype
    labels_ref,        # (tile_n, 1)        int32
    params_ref,        # (tile_rows, 128)   storage dtype
    bbloc_ref,         # (tile_rows, 128)   storage dtype
    out_ref,           # (1, 3, 8, 128) f32: [nll_sum, bb_sqsum, clf_sqsum]
    nll_acc,           # (1, 1)   f32 VMEM scratch (CE per-step reduce is tiny)
    bb_acc,            # (8, 128) f32 VMEM vector accumulator
    clf_acc,           # (8, 128) f32 VMEM vector accumulator
    *,
    n, d, p_total, tile_n, tile_rows,
    n_ce_tiles, n_p_tiles, ce_per, p_per, mask_rows,
):
    c = pl.program_id(0)          # split (TensorCore) index
    i = pl.program_id(1)          # step within this split
    last = pl.num_programs(1) - 1

    @pl.when(i == 0)
    def _init():
        nll_acc[...] = jnp.zeros_like(nll_acc)
        bb_acc[...] = jnp.zeros_like(bb_acc)
        clf_acc[...] = jnp.zeros_like(clf_acc)

    # ---- cross-entropy stream: this split's batch tiles ---------------------
    ce_j = c * ce_per + i
    @pl.when(jnp.logical_and(i < ce_per, ce_j < n_ce_tiles))
    def _ce():
        logits = logits_ref[...].astype(jnp.float32)            # (tile_n, C)
        labels = labels_ref[...]                                 # (tile_n, 1)
        tn, ncls = logits.shape
        col = lax.broadcasted_iota(jnp.int32, (tn, ncls), 1)
        picked = jnp.sum(jnp.where(col == labels, logits, 0.0),
                         axis=-1, keepdims=True)
        m = jnp.max(logits, axis=-1, keepdims=True)
        lse = m + jnp.log(jnp.sum(jnp.exp(logits - m), axis=-1, keepdims=True))
        per_example = lse - picked                               # (tile_n, 1)
        if mask_rows:  # static: only when tile_n does not divide N (edge block)
            row = ce_j * tile_n + lax.broadcasted_iota(jnp.int32, (tn, 1), 0)
            per_example = jnp.where(row < n, per_example, 0.0)
        nll_acc[...] += jnp.sum(per_example)

    # ---- L2-SP stream: this split's parameter tiles --------------------------
    d_full, d_rem = d // _LANES, d % _LANES          # backbone boundary (rows/lane)
    d_ceil = _cdiv(d, _LANES)
    p_full, p_rem = p_total // _LANES, p_total % _LANES

    p_j = c * p_per + i
    @pl.when(jnp.logical_and(i < p_per, p_j < n_p_tiles))
    def _reg():
        p = params_ref[...].astype(jnp.float32)                  # (tile_rows, 128)
        row0 = p_j * tile_rows                                   # global row offset
        row_hi = row0 + tile_rows

        # Fully-backbone tile: (row0 + tile_rows) * 128 <= d
        @pl.when(row_hi <= d_full)
        def _bb_only():
            diff = p - bbloc_ref[...].astype(jnp.float32)
            bb_acc[...] += _fold_to_vreg(diff * diff, tile_rows)

        # Fully-classifier tile: row0 * 128 >= d  (tail beyond p_total masked)
        @pl.when(row0 >= d_ceil)
        def _clf_only():
            grow = row0 + lax.broadcasted_iota(jnp.int32, p.shape, 0)
            lane = lax.broadcasted_iota(jnp.int32, p.shape, 1)
            in_p = jnp.logical_or(
                grow < p_full, jnp.logical_and(grow == p_full, lane < p_rem))
            clf_acc[...] += _fold_to_vreg(jnp.where(in_p, p * p, 0.0), tile_rows)

        # Boundary tile straddling D (at most one such tile)
        @pl.when(jnp.logical_and(row_hi > d_full, row0 < d_ceil))
        def _mixed():
            b = bbloc_ref[...].astype(jnp.float32)
            grow = row0 + lax.broadcasted_iota(jnp.int32, p.shape, 0)
            lane = lax.broadcasted_iota(jnp.int32, p.shape, 1)
            is_bb = jnp.logical_or(
                grow < d_full, jnp.logical_and(grow == d_full, lane < d_rem))
            in_p = jnp.logical_or(
                grow < p_full, jnp.logical_and(grow == p_full, lane < p_rem))
            diff = p - b
            bb_acc[...] += _fold_to_vreg(jnp.where(is_bb, diff * diff, 0.0),
                                         tile_rows)
            clf_acc[...] += _fold_to_vreg(
                jnp.where(jnp.logical_and(in_p, jnp.logical_not(is_bb)),
                          p * p, 0.0),
                tile_rows)

    # ---- finalize this split's partials (single store; reduce done in XLA) ---
    @pl.when(i == last)
    def _fin():
        sub = lax.broadcasted_iota(jnp.int32, (_SUBLANES, _LANES), 0)
        lane = lax.broadcasted_iota(jnp.int32, (_SUBLANES, _LANES), 1)
        out_ref[0, 0] = jnp.where(jnp.logical_and(sub == 0, lane == 0),
                                  nll_acc[0, 0], 0.0)
        out_ref[0, 1] = bb_acc[...]
        out_ref[0, 2] = clf_acc[...]


# ---------------------------------------------------------------------------
# Wrapper
# ---------------------------------------------------------------------------
def l2sp_loss_forward(
    logits, labels, params, bb_loc, alpha, beta, *,
    p_total=None, d=None,
    ce_tile_bytes=4 << 20, param_tile_bytes=2 << 20,
    num_splits=None, vmem_limit_bytes=None,
):
    n, ncls = map(int, logits.shape)

    # ---- parameters / bb_loc in lane-dense (rows, 128) layout ---------------
    if params.ndim == 1:
        # TODO(synk): callers should pack once with pack_flat() and keep params
        # in that layout across steps so this pad/copy is not paid every call.
        p_total = int(params.shape[0])
        params2d = pack_flat(params)
    else:
        if p_total is None:
            raise ValueError("pass p_total= when params is pre-packed (rows,128)")
        params2d = params
        p_total = int(p_total)
    if bb_loc.ndim == 1:
        d = int(bb_loc.shape[0])
        bbloc2d = pack_flat(bb_loc)
    else:
        if d is None:
            raise ValueError("pass d= when bb_loc is pre-packed (rows,128)")
        bbloc2d = bb_loc
        d = int(d)

    p_rows, bb_rows = int(params2d.shape[0]), int(bbloc2d.shape[0])
    assert params2d.shape[1] == _LANES and bbloc2d.shape[1] == _LANES
    assert p_rows % _SUBLANES == 0 and bb_rows % _SUBLANES == 0
    assert 0 <= d <= p_total <= p_rows * _LANES and d <= bb_rows * _LANES

    # ---- batch (cross-entropy) tiling: no padding; edge block + row mask -----
    labels2d = labels.astype(jnp.int32).reshape(n, 1)
    logits_isz = jnp.dtype(logits.dtype).itemsize
    row_bytes = ncls * logits_isz
    budget_rows = (ce_tile_bytes // max(row_bytes, 1)) // _SUBLANES * _SUBLANES
    tile_n = int(max(_SUBLANES, min(budget_rows, _round_up(n, _SUBLANES))))
    n_ce_tiles = _cdiv(n, tile_n)
    mask_rows = (n % tile_n) != 0

    # ---- parameter tiling ------------------------------------------------------
    p_isz = jnp.dtype(params2d.dtype).itemsize
    rows_budget = max(_SUBLANES,
                      (param_tile_bytes // (_LANES * p_isz))
                      // _SUBLANES * _SUBLANES)
    tile_rows = int(min(rows_budget, p_rows))
    n_p_tiles = _cdiv(p_rows, tile_rows)
    if bb_rows < tile_rows:          # keep the bb block within its array
        bbloc2d = jnp.pad(bbloc2d, ((0, tile_rows - bb_rows), (0, 0)))
        bb_rows = tile_rows
    n_bb_tiles = _cdiv(bb_rows, tile_rows)

    # ---- split the two streams across TensorCores (2x on v7x, free on 1-TC) --
    if num_splits is None:
        num_splits = 2 if max(n_ce_tiles, n_p_tiles) >= 2 else 1
    S = int(num_splits)
    ce_per = _cdiv(n_ce_tiles, S)
    p_per = _cdiv(n_p_tiles, S)
    steps = max(ce_per, p_per)

    if vmem_limit_bytes is None:
        bb_isz = jnp.dtype(bbloc2d.dtype).itemsize
        footprint = 2 * (tile_n * ncls * logits_isz + tile_n * 4
                         + tile_rows * _LANES * (p_isz + bb_isz)) + (1 << 20)
        vmem_limit_bytes = int(max(32 << 20, min(2 * footprint, 64 << 20)))

    kernel = functools.partial(
        _l2sp_kernel,
        n=n, d=d, p_total=p_total, tile_n=tile_n, tile_rows=tile_rows,
        n_ce_tiles=n_ce_tiles, n_p_tiles=n_p_tiles,
        ce_per=ce_per, p_per=p_per, mask_rows=mask_rows)

    # Clamped index maps: once a stream (CE or params) is exhausted for a split,
    # its block index stops changing and the pipeline stops re-issuing DMAs.
    raw = pl.pallas_call(
        kernel,
        out_shape=jax.ShapeDtypeStruct((S, 3, _SUBLANES, _LANES), jnp.float32),
        grid=(S, steps),
        in_specs=[
            pl.BlockSpec((tile_n, ncls),
                         lambda c, i: (jnp.minimum(c * ce_per + i,
                                                   n_ce_tiles - 1), 0)),
            pl.BlockSpec((tile_n, 1),
                         lambda c, i: (jnp.minimum(c * ce_per + i,
                                                   n_ce_tiles - 1), 0)),
            pl.BlockSpec((tile_rows, _LANES),
                         lambda c, i: (jnp.minimum(c * p_per + i,
                                                   n_p_tiles - 1), 0)),
            pl.BlockSpec((tile_rows, _LANES),
                         lambda c, i: (jnp.minimum(c * p_per + i,
                                                   n_bb_tiles - 1), 0)),
        ],
        out_specs=pl.BlockSpec((1, 3, _SUBLANES, _LANES),
                               lambda c, i: (c, 0, 0, 0)),
        scratch_shapes=[
            pltpu.VMEM((1, 1), jnp.float32),               # nll scalar acc
            pltpu.VMEM((_SUBLANES, _LANES), jnp.float32),  # bb vector acc
            pltpu.VMEM((_SUBLANES, _LANES), jnp.float32),  # clf vector acc
        ],
        compiler_params=pltpu.CompilerParams(
            dimension_semantics=("parallel", "arbitrary"),
            vmem_limit_bytes=int(vmem_limit_bytes)),
    )(logits, labels2d, params2d, bbloc2d)

    sums = jnp.sum(raw, axis=(0, 2, 3))                    # (3,) raw partial sums
    nll = sums[0] / jnp.float32(n)
    bb_log_prob = jnp.float32(alpha * 0.5) * sums[1]
    clf_log_prob = jnp.float32(beta * 0.5) * sums[2]
    loss = nll
    # unweighted_nll is already a scalar (mean reduction), so .mean() is itself.
    return loss, nll, bb_log_prob, clf_log_prob, nll


if __name__ == "__main__":
    key = jax.random.PRNGKey(0)
    k_logits, k_labels, k_params, k_bbloc = jax.random.split(key, 4)

    N, C = 8, 32          # batch, classes
    P_TOTAL = 48          # flat parameter vector length
    D = 32                # number of backbone params (len(bb_loc))
    ALPHA, BETA = 0.01, 0.02

    logits = jax.random.normal(k_logits, (N, C), dtype=jnp.float32)
    labels = jax.random.randint(k_labels, (N,), 0, C, dtype=jnp.int32)
    params = jax.random.normal(k_params, (P_TOTAL,), dtype=jnp.float32)
    bb_loc = jax.random.normal(k_bbloc, (D,), dtype=jnp.float32)

    # One-time packing into the lane-dense layout (bb_loc is frozen; params
    # should be kept in this layout across training steps to avoid per-call pads).
    params_packed = pack_flat(params)
    bbloc_packed = pack_flat(bb_loc)

    outs = l2sp_loss_forward(logits, labels, params_packed, bbloc_packed,
                             ALPHA, BETA, p_total=P_TOTAL, d=D)
    outs = jax.block_until_ready(outs)

    # Lightweight sanity check against a pure-JAX reference.
    logp = jax.nn.log_softmax(logits, axis=-1)
    ref_nll = -jnp.mean(logp[jnp.arange(N), labels])
    ref_bb = ALPHA / 2 * jnp.sum((params[:D] - bb_loc) ** 2)
    ref_clf = BETA / 2 * jnp.sum(params[D:] ** 2)
    assert jnp.allclose(outs[0], ref_nll, atol=1e-5)
    assert jnp.allclose(outs[1], ref_nll, atol=1e-5)
    assert jnp.allclose(outs[2], ref_bb, atol=1e-5)
    assert jnp.allclose(outs[3], ref_clf, atol=1e-5)
    assert jnp.allclose(outs[4], ref_nll, atol=1e-5)

    print("KERNEL_OK")
</pallas_src>

<mosaic_0001>
module attributes {stable_mosaic.version = 11 : i64} {
  func.func @_l2sp_kernel(%arg0: i32, %arg1: i32, %arg2: memref<8x32xf32, #tpu.memory_space<vmem>>, %arg3: memref<8x1xi32, #tpu.memory_space<vmem>>, %arg4: memref<8x128xf32, #tpu.memory_space<vmem>>, %arg5: memref<8x128xf32, #tpu.memory_space<vmem>>, %arg6: memref<1x3x8x128xf32, #tpu.memory_space<vmem>>, %arg7: memref<1x1xf32, #tpu.memory_space<vmem>>, %arg8: memref<8x128xf32, #tpu.memory_space<vmem>>, %arg9: memref<8x128xf32, #tpu.memory_space<vmem>>) attributes {dimension_semantics = [#tpu.dimension_semantics<parallel>, #tpu.dimension_semantics<arbitrary>], iteration_bounds = array<i64: 1, 1>, scalar_prefetch = 0 : i64, scratch_operands = 3 : i64, tpu.core_type = #tpu.core_type<tc>, window_params = [{transform_indices = @transform_0, window_bounds = array<i64: 8, 32>}, {transform_indices = @transform_1, window_bounds = array<i64: 8, 1>}, {transform_indices = @transform_2, window_bounds = array<i64: 8, 128>}, {transform_indices = @transform_3, window_bounds = array<i64: 8, 128>}, {transform_indices = @transform_4, window_bounds = array<i64: 1, 3, 8, 128>}]} {
    %c0_i32 = arith.constant 0 : i32
    %0 = arith.cmpi eq, %arg1, %c0_i32 : i32
    %1 = arith.extui %0 : i1 to i32
    %c0_i32_0 = arith.constant 0 : i32
    %2 = arith.cmpi ne, %1, %c0_i32_0 : i32
    scf.if %2 {
      %cst = arith.constant 0.000000e+00 : f32
      %20 = vector.broadcast %cst : f32 to vector<1x1xf32>
      %c0 = arith.constant 0 : index
      %c0_10 = arith.constant 0 : index
      %21 = vector.load %arg7[%c0, %c0_10] : memref<1x1xf32, #tpu.memory_space<vmem>>, vector<1x1xf32>
      tpu.vector_store %arg7[%c0, %c0_10], %20 {strides = array<i32>} : memref<1x1xf32, #tpu.memory_space<vmem>>, vector<1x1xf32>,
      %cst_11 = arith.constant 0.000000e+00 : f32
      %22 = vector.broadcast %cst_11 : f32 to vector<8x128xf32>
      %c0_12 = arith.constant 0 : index
      %c0_13 = arith.constant 0 : index
      %23 = vector.load %arg8[%c0_12, %c0_13] : memref<8x128xf32, #tpu.memory_space<vmem>>, vector<8x128xf32>
      tpu.vector_store %arg8[%c0_12, %c0_13], %22 {strides = array<i32>} : memref<8x128xf32, #tpu.memory_space<vmem>>, vector<8x128xf32>,
      %cst_14 = arith.constant 0.000000e+00 : f32
      %24 = vector.broadcast %cst_14 : f32 to vector<8x128xf32>
      %c0_15 = arith.constant 0 : index
      %c0_16 = arith.constant 0 : index
      %25 = vector.load %arg9[%c0_15, %c0_16] : memref<8x128xf32, #tpu.memory_space<vmem>>, vector<8x128xf32>
      tpu.vector_store %arg9[%c0_15, %c0_16], %24 {strides = array<i32>} : memref<8x128xf32, #tpu.memory_space<vmem>>, vector<8x128xf32>,
    } else {
    }
    %c1_i32 = arith.constant 1 : i32
    %3 = arith.muli %arg0, %c1_i32 : i32
    %4 = arith.addi %3, %arg1 : i32
    %c1_i32_1 = arith.constant 1 : i32
    %5 = arith.cmpi slt, %arg1, %c1_i32_1 : i32
    %c1_i32_2 = arith.constant 1 : i32
    %6 = arith.cmpi slt, %4, %c1_i32_2 : i32
    %7 = arith.andi %5, %6 : i1
    %8 = arith.extui %7 : i1 to i32
    %c0_i32_3 = arith.constant 0 : i32
    %9 = arith.cmpi ne, %8, %c0_i32_3 : i32
    scf.if %9 {
      %c0 = arith.constant 0 : index
      %c0_10 = arith.constant 0 : index
      %20 = vector.load %arg2[%c0, %c0_10] : memref<8x32xf32, #tpu.memory_space<vmem>>, vector<8x32xf32>
      %c0_11 = arith.constant 0 : index
      %c0_12 = arith.constant 0 : index
      %21 = vector.load %arg3[%c0_11, %c0_12] : memref<8x1xi32, #tpu.memory_space<vmem>>, vector<8x1xi32>
      %22 = tpu.iota {dimensions = array<i32: 1>} : vector<8x32xi32>
      %23 = vector.broadcast %21 : vector<8x1xi32> to vector<8x32xi32>
      %24 = arith.cmpi eq, %22, %23 : vector<8x32xi32>
      %cst = arith.constant 0.000000e+00 : f32
      %25 = vector.broadcast %cst : f32 to vector<8x32xf32>
      %26 = arith.select %24, %20, %25 : vector<8x32xi1>, vector<8x32xf32>
      %cst_13 = arith.constant dense<0.000000e+00> : vector<8xf32>
      %27 = vector.multi_reduction <add>, %26, %cst_13 [1] : vector<8x32xf32> to vector<8xf32>
      %28 = vector.shape_cast %27 : vector<8xf32> to vector<8x1xf32>
      %cst_14 = arith.constant dense<0xFF800000> : vector<8xf32>
      %29 = vector.multi_reduction <maximumf>, %20, %cst_14 [1] : vector<8x32xf32> to vector<8xf32>
      %30 = vector.shape_cast %29 : vector<8xf32> to vector<8x1xf32>
      %31 = vector.broadcast %30 : vector<8x1xf32> to vector<8x32xf32>
      %32 = arith.subf %20, %31 : vector<8x32xf32>
      %33 = math.exp %32 : vector<8x32xf32>
      %cst_15 = arith.constant dense<0.000000e+00> : vector<8xf32>
      %34 = vector.multi_reduction <add>, %33, %cst_15 [1] : vector<8x32xf32> to vector<8xf32>
      %35 = vector.shape_cast %34 : vector<8xf32> to vector<8x1xf32>
      %36 = math.log %35 : vector<8x1xf32>
      %37 = arith.addf %30, %36 : vector<8x1xf32>
      %38 = arith.subf %37, %28 : vector<8x1xf32>
      %c0_16 = arith.constant 0 : index
      %c0_17 = arith.constant 0 : index
      %39 = vector.load %arg7[%c0_16, %c0_17] : memref<1x1xf32, #tpu.memory_space<vmem>>, vector<1x1xf32>
      %40 = vector.shape_cast %38 : vector<8x1xf32> to vector<1x8x1xf32>
      %cst_18 = arith.constant dense<0.000000e+00> : vector<1xf32>
      %41 = vector.multi_reduction <add>, %40, %cst_18 [1, 2] : vector<1x8x1xf32> to vector<1xf32>
      %42 = vector.shape_cast %41 : vector<1xf32> to vector<1x1x1xf32>
      %43 = vector.extract %42[0, 0, 0] : f32 from vector<1x1x1xf32>
      %44 = vector.broadcast %43 : f32 to vector<1x1xf32>
      %45 = arith.addf %39, %44 : vector<1x1xf32>
      %c0_19 = arith.constant 0 : index
      %c0_20 = arith.constant 0 : index
      %46 = vector.load %arg7[%c0_19, %c0_20] : memref<1x1xf32, #tpu.memory_space<vmem>>, vector<1x1xf32>
      tpu.vector_store %arg7[%c0_19, %c0_20], %45 {strides = array<i32>} : memref<1x1xf32, #tpu.memory_space<vmem>>, vector<1x1xf32>,
    } else {
    }
    %c1_i32_4 = arith.constant 1 : i32
    %10 = arith.muli %arg0, %c1_i32_4 : i32
    %11 = arith.addi %10, %arg1 : i32
    %c1_i32_5 = arith.constant 1 : i32
    %12 = arith.cmpi slt, %arg1, %c1_i32_5 : i32
    %c1_i32_6 = arith.constant 1 : i32
    %13 = arith.cmpi slt, %11, %c1_i32_6 : i32
    %14 = arith.andi %12, %13 : i1
    %15 = arith.extui %14 : i1 to i32
    %c0_i32_7 = arith.constant 0 : i32
    %16 = arith.cmpi ne, %15, %c0_i32_7 : i32
    scf.if %16 {
      %c0 = arith.constant 0 : index
      %c0_10 = arith.constant 0 : index
      %20 = vector.load %arg4[%c0, %c0_10] : memref<8x128xf32, #tpu.memory_space<vmem>>, vector<8x128xf32>
      %c8_i32 = arith.constant 8 : i32
      %21 = arith.muli %11, %c8_i32 : i32
      %c8_i32_11 = arith.constant 8 : i32
      %22 = arith.addi %21, %c8_i32_11 : i32
      %c0_i32_12 = arith.constant 0 : i32
      %23 = arith.cmpi sle, %22, %c0_i32_12 : i32
      %24 = arith.extui %23 : i1 to i32
      %c0_i32_13 = arith.constant 0 : i32
      %25 = arith.cmpi ne, %24, %c0_i32_13 : i32
      scf.if %25 {
        %c0_19 = arith.constant 0 : index
        %c0_20 = arith.constant 0 : index
        %34 = vector.load %arg5[%c0_19, %c0_20] : memref<8x128xf32, #tpu.memory_space<vmem>>, vector<8x128xf32>
        %35 = arith.subf %20, %34 : vector<8x128xf32>
        %c0_21 = arith.constant 0 : index
        %c0_22 = arith.constant 0 : index
        %36 = vector.load %arg8[%c0_21, %c0_22] : memref<8x128xf32, #tpu.memory_space<vmem>>, vector<8x128xf32>
        %37 = arith.mulf %35, %35 : vector<8x128xf32>
        %38 = arith.addf %36, %37 : vector<8x128xf32>
        %c0_23 = arith.constant 0 : index
        %c0_24 = arith.constant 0 : index
        %39 = vector.load %arg8[%c0_23, %c0_24] : memref<8x128xf32, #tpu.memory_space<vmem>>, vector<8x128xf32>
        tpu.vector_store %arg8[%c0_23, %c0_24], %38 {strides = array<i32>} : memref<8x128xf32, #tpu.memory_space<vmem>>, vector<8x128xf32>,
      } else {
      }
      %c1_i32_14 = arith.constant 1 : i32
      %26 = arith.cmpi sge, %21, %c1_i32_14 : i32
      %27 = arith.extui %26 : i1 to i32
      %c0_i32_15 = arith.constant 0 : i32
      %28 = arith.cmpi ne, %27, %c0_i32_15 : i32
      scf.if %28 {
        %34 = tpu.iota {dimensions = array<i32: 0>} : vector<8x128xi32>
        %35 = vector.broadcast %21 : i32 to vector<8x128xi32>
        %36 = arith.addi %35, %34 : vector<8x128xi32>
        %37 = tpu.iota {dimensions = array<i32: 1>} : vector<8x128xi32>
        %c0_i32_19 = arith.constant 0 : i32
        %38 = vector.broadcast %c0_i32_19 : i32 to vector<8x128xi32>
        %39 = arith.cmpi slt, %36, %38 : vector<8x128xi32>
        %c0_i32_20 = arith.constant 0 : i32
        %40 = vector.broadcast %c0_i32_20 : i32 to vector<8x128xi32>
        %41 = arith.cmpi eq, %36, %40 : vector<8x128xi32>
        %c48_i32 = arith.constant 48 : i32
        %42 = vector.broadcast %c48_i32 : i32 to vector<8x128xi32>
        %43 = arith.cmpi slt, %37, %42 : vector<8x128xi32>
        %44 = arith.andi %41, %43 : vector<8x128xi1>
        %45 = arith.ori %39, %44 : vector<8x128xi1>
        %c0_21 = arith.constant 0 : index
        %c0_22 = arith.constant 0 : index
        %46 = vector.load %arg9[%c0_21, %c0_22] : memref<8x128xf32, #tpu.memory_space<vmem>>, vector<8x128xf32>
        %47 = arith.mulf %20, %20 : vector<8x128xf32>
        %cst = arith.constant 0.000000e+00 : f32
        %48 = vector.broadcast %cst : f32 to vector<8x128xf32>
        %49 = arith.select %45, %47, %48 : vector<8x128xi1>, vector<8x128xf32>
        %50 = arith.addf %46, %49 : vector<8x128xf32>
        %c0_23 = arith.constant 0 : index
        %c0_24 = arith.constant 0 : index
        %51 = vector.load %arg9[%c0_23, %c0_24] : memref<8x128xf32, #tpu.memory_space<vmem>>, vector<8x128xf32>
        tpu.vector_store %arg9[%c0_23, %c0_24], %50 {strides = array<i32>} : memref<8x128xf32, #tpu.memory_space<vmem>>, vector<8x128xf32>,
      } else {
      }
      %c0_i32_16 = arith.constant 0 : i32
      %29 = arith.cmpi sgt, %22, %c0_i32_16 : i32
      %c1_i32_17 = arith.constant 1 : i32
      %30 = arith.cmpi slt, %21, %c1_i32_17 : i32
      %31 = arith.andi %29, %30 : i1
      %32 = arith.extui %31 : i1 to i32
      %c0_i32_18 = arith.constant 0 : i32
      %33 = arith.cmpi ne, %32, %c0_i32_18 : i32
      scf.if %33 {
        %c0_19 = arith.constant 0 : index
        %c0_20 = arith.constant 0 : index
        %34 = vector.load %arg5[%c0_19, %c0_20] : memref<8x128xf32, #tpu.memory_space<vmem>>, vector<8x128xf32>
        %35 = tpu.iota {dimensions = array<i32: 0>} : vector<8x128xi32>
        %36 = vector.broadcast %21 : i32 to vector<8x128xi32>
        %37 = arith.addi %36, %35 : vector<8x128xi32>
        %38 = tpu.iota {dimensions = array<i32: 1>} : vector<8x128xi32>
        %c0_i32_21 = arith.constant 0 : i32
        %39 = vector.broadcast %c0_i32_21 : i32 to vector<8x128xi32>
        %40 = arith.cmpi slt, %37, %39 : vector<8x128xi32>
        %c0_i32_22 = arith.constant 0 : i32
        %41 = vector.broadcast %c0_i32_22 : i32 to vector<8x128xi32>
        %42 = arith.cmpi eq, %37, %41 : vector<8x128xi32>
        %c32_i32 = arith.constant 32 : i32
        %43 = vector.broadcast %c32_i32 : i32 to vector<8x128xi32>
        %44 = arith.cmpi slt, %38, %43 : vector<8x128xi32>
        %45 = arith.andi %42, %44 : vector<8x128xi1>
        %46 = arith.ori %40, %45 : vector<8x128xi1>
        %c0_i32_23 = arith.constant 0 : i32
        %47 = vector.broadcast %c0_i32_23 : i32 to vector<8x128xi32>
        %48 = arith.cmpi slt, %37, %47 : vector<8x128xi32>
        %c0_i32_24 = arith.constant 0 : i32
        %49 = vector.broadcast %c0_i32_24 : i32 to vector<8x128xi32>
        %50 = arith.cmpi eq, %37, %49 : vector<8x128xi32>
        %c48_i32 = arith.constant 48 : i32
        %51 = vector.broadcast %c48_i32 : i32 to vector<8x128xi32>
        %52 = arith.cmpi slt, %38, %51 : vector<8x128xi32>
        %53 = arith.andi %50, %52 : vector<8x128xi1>
        %54 = arith.ori %48, %53 : vector<8x128xi1>
        %55 = arith.subf %20, %34 : vector<8x128xf32>
        %c0_25 = arith.constant 0 : index
        %c0_26 = arith.constant 0 : index
        %56 = vector.load %arg8[%c0_25, %c0_26] : memref<8x128xf32, #tpu.memory_space<vmem>>, vector<8x128xf32>
        %57 = arith.mulf %55, %55 : vector<8x128xf32>
        %cst = arith.constant 0.000000e+00 : f32
        %58 = vector.broadcast %cst : f32 to vector<8x128xf32>
        %59 = arith.select %46, %57, %58 : vector<8x128xi1>, vector<8x128xf32>
        %60 = arith.addf %56, %59 : vector<8x128xf32>
        %c0_27 = arith.constant 0 : index
        %c0_28 = arith.constant 0 : index
        %61 = vector.load %arg8[%c0_27, %c0_28] : memref<8x128xf32, #tpu.memory_space<vmem>>, vector<8x128xf32>
        tpu.vector_store %arg8[%c0_27, %c0_28], %60 {strides = array<i32>} : memref<8x128xf32, #tpu.memory_space<vmem>>, vector<8x128xf32>,
        %c0_29 = arith.constant 0 : index
        %c0_30 = arith.constant 0 : index
        %62 = vector.load %arg9[%c0_29, %c0_30] : memref<8x128xf32, #tpu.memory_space<vmem>>, vector<8x128xf32>
        %cst_31 = arith.constant dense<true> : vector<8x128xi1>
        %63 = arith.xori %46, %cst_31 : vector<8x128xi1>
        %64 = arith.andi %54, %63 : vector<8x128xi1>
        %65 = arith.mulf %20, %20 : vector<8x128xf32>
        %cst_32 = arith.constant 0.000000e+00 : f32
        %66 = vector.broadcast %cst_32 : f32 to vector<8x128xf32>
        %67 = arith.select %64, %65, %66 : vector<8x128xi1>, vector<8x128xf32>
        %68 = arith.addf %62, %67 : vector<8x128xf32>
        %c0_33 = arith.constant 0 : index
        %c0_34 = arith.constant 0 : index
        %69 = vector.load %arg9[%c0_33, %c0_34] : memref<8x128xf32, #tpu.memory_space<vmem>>, vector<8x128xf32>
        tpu.vector_store %arg9[%c0_33, %c0_34], %68 {strides = array<i32>} : memref<8x128xf32, #tpu.memory_space<vmem>>, vector<8x128xf32>,
      } else {
      }
    } else {
    }
    %c0_i32_8 = arith.constant 0 : i32
    %17 = arith.cmpi eq, %arg1, %c0_i32_8 : i32
    %18 = arith.extui %17 : i1 to i32
    %c0_i32_9 = arith.constant 0 : i32
    %19 = arith.cmpi ne, %18, %c0_i32_9 : i32
    scf.if %19 {
      %20 = tpu.iota {dimensions = array<i32: 0>} : vector<8x128xi32>
      %21 = tpu.iota {dimensions = array<i32: 1>} : vector<8x128xi32>
      %c0_i32_10 = arith.constant 0 : i32
      %22 = vector.broadcast %c0_i32_10 : i32 to vector<8x128xi32>
      %23 = arith.cmpi eq, %20, %22 : vector<8x128xi32>
      %c0_i32_11 = arith.constant 0 : i32
      %24 = vector.broadcast %c0_i32_11 : i32 to vector<8x128xi32>
      %25 = arith.cmpi eq, %21, %24 : vector<8x128xi32>
      %26 = arith.andi %23, %25 : vector<8x128xi1>
      %c0 = arith.constant 0 : index
      %c0_12 = arith.constant 0 : index
      %27 = vector.load %arg7[%c0, %c0_12] : memref<1x1xf32, #tpu.memory_space<vmem>>, vector<1x1xf32>
      %28 = vector.extract %27[0, 0] : f32 from vector<1x1xf32>
      %cst = arith.constant 0.000000e+00 : f32
      %29 = vector.broadcast %28 : f32 to vector<8x128xf32>
      %30 = vector.broadcast %cst : f32 to vector<8x128xf32>
      %31 = arith.select %26, %29, %30 : vector<8x128xi1>, vector<8x128xf32>
      %c0_13 = arith.constant 0 : index
      %c0_14 = arith.constant 0 : index
      %c0_15 = arith.constant 0 : index
      %c0_16 = arith.constant 0 : index
      %32 = vector.load %arg6[%c0_13, %c0_14, %c0_15, %c0_16] : memref<1x3x8x128xf32, #tpu.memory_space<vmem>>, vector<1x1x8x128xf32>
      %33 = vector.shape_cast %32 : vector<1x1x8x128xf32> to vector<8x128xf32>
      %34 = vector.shape_cast %31 : vector<8x128xf32> to vector<1x1x8x128xf32>
      tpu.vector_store %arg6[%c0_13, %c0_14, %c0_15, %c0_16], %34 {strides = array<i32>} : memref<1x3x8x128xf32, #tpu.memory_space<vmem>>, vector<1x1x8x128xf32>,
      %c0_17 = arith.constant 0 : index
      %c0_18 = arith.constant 0 : index
      %35 = vector.load %arg8[%c0_17, %c0_18] : memref<8x128xf32, #tpu.memory_space<vmem>>, vector<8x128xf32>
      %c0_19 = arith.constant 0 : index
      %c1 = arith.constant 1 : index
      %c0_20 = arith.constant 0 : index
      %c0_21 = arith.constant 0 : index
      %36 = vector.load %arg6[%c0_19, %c1, %c0_20, %c0_21] : memref<1x3x8x128xf32, #tpu.memory_space<vmem>>, vector<1x1x8x128xf32>
      %37 = vector.shape_cast %36 : vector<1x1x8x128xf32> to vector<8x128xf32>
      %38 = vector.shape_cast %35 : vector<8x128xf32> to vector<1x1x8x128xf32>
      tpu.vector_store %arg6[%c0_19, %c1, %c0_20, %c0_21], %38 {strides = array<i32>} : memref<1x3x8x128xf32, #tpu.memory_space<vmem>>, vector<1x1x8x128xf32>,
      %c0_22 = arith.constant 0 : index
      %c0_23 = arith.constant 0 : index
      %39 = vector.load %arg9[%c0_22, %c0_23] : memref<8x128xf32, #tpu.memory_space<vmem>>, vector<8x128xf32>
      %c0_24 = arith.constant 0 : index
      %c2 = arith.constant 2 : index
      %c0_25 = arith.constant 0 : index
      %c0_26 = arith.constant 0 : index
      %40 = vector.load %arg6[%c0_24, %c2, %c0_25, %c0_26] : memref<1x3x8x128xf32, #tpu.memory_space<vmem>>, vector<1x1x8x128xf32>
      %41 = vector.shape_cast %40 : vector<1x1x8x128xf32> to vector<8x128xf32>
      %42 = vector.shape_cast %39 : vector<8x128xf32> to vector<1x1x8x128xf32>
      tpu.vector_store %arg6[%c0_24, %c2, %c0_25, %c0_26], %42 {strides = array<i32>} : memref<1x3x8x128xf32, #tpu.memory_space<vmem>>, vector<1x1x8x128xf32>,
    } else {
    }
    return
  }
  func.func @transform_0(%arg0: i32, %arg1: i32) -> (i32, i32) {
    %c1_i32 = arith.constant 1 : i32
    %0 = arith.muli %arg0, %c1_i32 : i32
    %1 = arith.addi %0, %arg1 : i32
    %c0_i32 = arith.constant 0 : i32
    %2 = arith.minsi %1, %c0_i32 : i32
    %c0_i32_0 = arith.constant 0 : i32
    %c0_i32_1 = arith.constant 0 : i32
    return %2, %c0_i32_0 : i32, i32
  }
  func.func @transform_1(%arg0: i32, %arg1: i32) -> (i32, i32) {
    %c1_i32 = arith.constant 1 : i32
    %0 = arith.muli %arg0, %c1_i32 : i32
    %1 = arith.addi %0, %arg1 : i32
    %c0_i32 = arith.constant 0 : i32
    %2 = arith.minsi %1, %c0_i32 : i32
    %c0_i32_0 = arith.constant 0 : i32
    %c0_i32_1 = arith.constant 0 : i32
    return %2, %c0_i32_0 : i32, i32
  }
  func.func @transform_2(%arg0: i32, %arg1: i32) -> (i32, i32) {
    %c1_i32 = arith.constant 1 : i32
    %0 = arith.muli %arg0, %c1_i32 : i32
    %1 = arith.addi %0, %arg1 : i32
    %c0_i32 = arith.constant 0 : i32
    %2 = arith.minsi %1, %c0_i32 : i32
    %c0_i32_0 = arith.constant 0 : i32
    %c0_i32_1 = arith.constant 0 : i32
    return %2, %c0_i32_0 : i32, i32
  }
  func.func @transform_3(%arg0: i32, %arg1: i32) -> (i32, i32) {
    %c1_i32 = arith.constant 1 : i32
    %0 = arith.muli %arg0, %c1_i32 : i32
    %1 = arith.addi %0, %arg1 : i32
    %c0_i32 = arith.constant 0 : i32
    %2 = arith.minsi %1, %c0_i32 : i32
    %c0_i32_0 = arith.constant 0 : i32
    %c0_i32_1 = arith.constant 0 : i32
    return %2, %c0_i32_0 : i32, i32
  }
  func.func @transform_4(%arg0: i32, %arg1: i32) -> (i32, i32, i32, i32) {
    %c0_i32 = arith.constant 0 : i32
    %c0_i32_0 = arith.constant 0 : i32
    %c0_i32_1 = arith.constant 0 : i32
    %c0_i32_2 = arith.constant 0 : i32
    return %arg0, %c0_i32, %c0_i32_0, %c0_i32_1 : i32, i32, i32, i32
  }
}

</mosaic_0001>

<bundles_post_ra>
// kernel: tpu_custom_call.1
= control target key start
LH: loop header
LB: loop body
LE: loop exit
PB: predicated region body
PF: predicated region fallthrough
CT: control target
= control target key end

     0   :  { %9 = vsyncpa [#allocation6], 0  ;;  %s444_s0 = inlined_call_operand.vmem [shape: f32[8,32], index: 0, kind: input, shape index: {}]   ;;  %s445_s1 = inlined_call_operand.vmem [shape: s32[8,1], index: 1, kind: input, shape index: {}]   ;;  %s446_s2 = inlined_call_operand.hbm [shape: f32[8,128], index: 2, kind: input, shape index: {}]   ;;  %s447_s3 = inlined_call_operand.hbm [shape: f32[8,128], index: 3, kind: input, shape index: {}]   ;;  %s448_s4 = inlined_call_operand.hbm [shape: f32[1,3,8,128], index: 4, kind: output, shape index: {}]  }
   0x1   :  { %10 = vsyncpa [#allocation9], 0 }
   0x2   :  { %11 = vsyncpa [#allocation7], 0  ;;  %s46_s17 = sshll.u32 %s446_s2, 4  ;;  %s388_s18 = smov [#allocation5]   ;;  %s47_s17 = int_to_ptr.hbm [resolvable:$true] %s46_s17 }
   0x3   :  { %s48_s19 = sshll.u32 %s388_s18, 4  ;;  %s62_s22 = sshll.u32 %s447_s3, 4  ;;  %s49_s19 = int_to_ptr.vmem [resolvable:$true] %s48_s19  ;;  %s63_s22 = int_to_ptr.hbm [resolvable:$true] %s62_s22 }
   0x4   :  { %51 = dma.hbm_to_vmem [thread:$0]  %s47_s17, 128, %s49_s19, [#allocation6]  }
   0x5   :  { %s389_s23 = smov [#allocation8]  }
   0x6   :  { %s64_s24 = sshll.u32 %s389_s23, 4  ;;  %s65_s24 = int_to_ptr.vmem [resolvable:$true] %s64_s24 }
   0x7   :  { %67 = dma.hbm_to_vmem [thread:$0]  %s63_s22, 128, %s65_s24, [#allocation9]  }
   0x8   :  { %382 = dma.done.wait [#allocation6], 128  }
   0x9   :  { %383 = vsyncadd [#allocation6], 4294967168 }
   0xa   :  { %384 = dma.done.wait [#allocation9], 128  }
   0xb   :  { %385 = vsyncadd [#allocation9], 4294967168  ;;  %v390_v0 = vmov 0   ;;  %vm140_vm0 = vcmask 261120   ;;  %v131_v1 = vld [vmem:[%s444_s0] sm:$0xff]  ;;  %v133_v9 = vlaneseq  ;;  %vm158_vm2 = vcmask 7168  }
   0xc   :  { %305 = vset.pattern.permute.xlu0 %v390_v0  ;;  %v144_v2 = vsel %vm140_vm0, %v131_v1, -inf  ;;  %v132_v3 = vld [vmem:[%s445_s1] sm:$0xff]  ;;  %vm120_vm3 = vcmask 0   ;;  %v391_v21 = vmov 0.0   ;;  %v210_v30 = vld [vmem:[#allocation8] sm:$0xff]  ;;  %vm392_vm9 = vmmov 1  }
   0xd   :  { %145 = vmax.xlane.f32.xlu0 %v144_v2  ;;  %v134_v10 = vand.u32 127, %v133_v9  ;;  %121 = vst.msk [vmem:[#allocation2] sm:$0x1] %vm120_vm3, %v391_v21  ;;  %v173_v29 = vld [vmem:[#allocation5] sm:$0xff]  ;;  %v212_v31 = vshrl.u32 %v133_v9, 7  ;;  %s393_s1 = smov [#allocation10]  }
   0xe   :  { %v223_v32 = vsub.f32 %v173_v29, %v210_v30  ;;  %v232_v34 = vmul.f32 %v173_v29, %v173_v29  ;;  %s261_s27 = sshll.u32 %s393_s1, 4  ;;  %s263_s30 = sshll.u32 %s448_s4, 4  ;;  %s262_s27 = int_to_ptr.vmem [resolvable:$true] %s261_s27  ;;  %s264_s30 = int_to_ptr.hbm [resolvable:$true] %s263_s30 }
   0xf   :  { %vm217_vm4 = vcmp.lt.s32.totalorder %v134_v10, 32  ;;  %vm220_vm5 = vcmp.lt.s32.totalorder %v134_v10, 48  ;;  %vm216_vm6 = vcmp.eq.s32.totalorder %v212_v31, 0  ;;  %vm244_vm12 = vcmp.eq.s32.totalorder %v134_v10, 0  ;;  %s394_s6 = smov 128   ;;  %s395_s7 = smov 8  }
  0x10   :  { %vm218_vm7 = vmand %vm216_vm6, %vm217_vm4  ;;  %v225_v33 = vmul.f32 %v223_v32, %v223_v32 }
  0x11   :  { %vm221_vm8 = vmand %vm216_vm6, %vm220_vm5 }
  0x12   :  { %v226_v35 = vsel %vm218_vm7, %v225_v33, 0.0  ;;  %vm230_vm10 = vmxor %vm218_vm7, %vm392_vm9 }
  0x13   :  { %vm231_vm11 = vmand %vm221_vm8, %vm230_vm10  ;;  %253 = vst [vmem:[#allocation10 + $0x8] sm:$0xff] %v226_v35 }
  0x14   :  { %v233_v36 = vsel %vm231_vm11, %v232_v34, 0.0  ;;  %v157_v37 = vld [vmem:[#allocation2] sm:$0x1]  ;;  %vm245_vm13 = vmand %vm216_vm6, %vm244_vm12 }
  0x15   :  { %256 = vst [vmem:[#allocation10 + $0x10] sm:$0xff] %v233_v36 }
  0x21   :  { %136 = vperm.xlu0 %305, %v132_v3  }
  0x80   :  { %v146_v4 = vpop.xlane.xlu0 %145 }
  0x81   :  { %v147_v5 = vsub.f32 %v131_v1, %v146_v4 }
  0x83   :  { %v148_v6 = vmul.f32 1.442695, %v147_v5 }
  0x85   :  { %306 = vpow2.f32 %v148_v6 }
  0x8b   :  { %v307_v7 = vpop.eup %306 }
  0x8c   :  { %v150_v8 = vsel %vm140_vm0, %v307_v7, 0.0 }
  0x8d   :  { %151 = vadd.xlane.f32.xlu1 %v150_v8 }
  0x93   :  { %v137_v11 = vpop.permute.xlu0 %136 }
  0x94   :  { %vm138_vm1 = vcmp.eq.s32.totalorder %v134_v10, %v137_v11 }
  0x95   :  { %v139_v12 = vsel %vm138_vm1, %v131_v1, 0.0 }
  0x96   :  { %v141_v13 = vsel %vm140_vm0, %v139_v12, 0.0 }
  0x97   :  { %142 = vadd.xlane.f32.xlu1 %v141_v13 }
 0x100   :  { %v152_v14 = vpop.xlane.xlu1 %151 }
 0x101   :  { %308 = vlog2.f32 %v152_v14 }
 0x107   :  { %v309_v15 = vpop.eup %308 }
 0x108   :  { %v154_v16 = vmul.f32 0.6931472, %v309_v15 }
 0x10a   :  { %v155_v17 = vadd.f32 %v154_v16, %v146_v4  ;;  %v143_v18 = vpop.xlane.xlu1 %142 }
 0x10c   :  { %v156_v19 = vsub.f32 %v155_v17, %v143_v18 }
 0x10e   :  { %v159_v20 = vsel %vm158_vm2, %v156_v19, 0.0 }
 0x10f   :  { %160 = vadd.xlane.f32.xlu2 %v159_v20 }
 0x182   :  { %v161_v22 = vpop.xlane.xlu2 %160 }
 0x183   :  { %v162_v23 = vrot.slane %v161_v22, 4 }
 0x185   :  { %v163_v24 = vadd.f32 %v162_v23, %v161_v22 }
 0x187   :  { %v164_v25 = vrot.slane %v163_v24, 2 }
 0x189   :  { %v165_v26 = vadd.f32 %v164_v25, %v163_v24 }
 0x18b   :  { %v166_v27 = vrot.slane %v165_v26, 1 }
 0x18d   :  { %v167_v28 = vadd.f32 %v166_v27, %v165_v26 }
 0x18f   :  { %293 = vpush %v167_v28 }
 0x1c0   :  { %s294_s0 = spop %293 }
 0x1c1   :  { %v169_v38 = vstv %s294_s0 }
 0x1c2   :  { %v170_v39 = vadd.f32 %v169_v38, %v157_v37 }
 0x1c4   :  { %172 = vst.msk [vmem:[#allocation2] sm:$0x1] %vm120_vm3, %v170_v39 }
 0x1cb   :  { %v246_v40 = vld [vmem:[#allocation2] sm:$0x1] }
 0x1cc   :  { %295 = vpush %v246_v40 }
 0x1fd   :  { %s296_s5 = spop %295 }
 0x1fe   :  { %v248_v41 = vstv %s296_s5 }
 0x1ff   :  { %v249_v42 = vsel %vm245_vm13, %v248_v41, 0.0 }
 0x200   :  { %250 = vst [vmem:[#allocation10] sm:$0xff] %v249_v42 }
 0x201   :  { %269 = dma.vmem_to_hbm [thread:$0]  %s262_s27, 384, %s264_s30, [#allocation7], %s394_s6, %s394_s6, %s395_s7  }
 0x202   :  { %386 = dma.done.wait [#allocation7], 384  }
 0x203   :  { %387 = vsyncadd [#allocation7], 4294966912 }
 0x204   :  { %274 = vsyncpa [#allocation6], 1 }
 0x205   :  { %275 = vsyncpa [#allocation9], 1 }
 0x206   :  { %276 = vsyncpa [#allocation7], 1 }

</bundles_post_ra>
